<compile_context>
chip_gen: v6e
topology: v6e:2x2x1
jax: 0.10.0
libtpu: 0.0.40
codegen_flags: <defaults>
</compile_context>

<pallas_src>
import functools

import jax
import jax.numpy as jnp
from jax.experimental import pallas as pl
from jax.experimental.pallas import tpu as pltpu


def _round_up(x: int, m: int) -> int:
    return ((x + m - 1) // m) * m


def _discriminator_kernel(x_ref, w1_ref, b1_ref, w2_ref, o_ref, *,
                          apply_sigmoid: bool):
    # x: (tile_n, H) f32, w1: (H, D) bf16 (BN folded), b1/w2: (1, D) f32,
    # o: (tile_n, 1) f32.
    x = x_ref[...].astype(jnp.bfloat16)          # VPU cast, hidden under DMA
    # Linear(h, D) with the eval-BN affine folded into w1/b1, f32 accumulate.
    y = jnp.dot(x, w1_ref[...], preferred_element_type=jnp.float32)
    y = jnp.maximum(y + b1_ref[...], 0.0)        # bias + ReLU (VPU, f32)
    # Linear(D, 1, bias=False): width-1 output -> VPU multiply + lane reduce
    # (keeps the MXU for the big GEMM; kernel is HBM-bound with VPU slack).
    z = jnp.sum(y * w2_ref[...], axis=-1, keepdims=True)
    if apply_sigmoid:
        # Numerically stable sigmoid on the EUP: 0.5 * (tanh(z/2) + 1).
        z = 0.5 * (jnp.tanh(0.5 * z) + 1.0)
    o_ref[...] = z.astype(o_ref.dtype)


def prepare_params(params, eps: float = 1e-5):
    """One-time weight preparation (call once per parameter update).

    Folds eval-mode BatchNorm into the first Linear and casts the big weight
    to bf16 so the per-call forward does no weight-side HBM passes.
    Note: extreme BN scales could lose precision in the bf16-folded weights.
    """
    scale = params["bn_gamma"] / jnp.sqrt(params["bn_var"] + eps)    # (1, D)
    shift = params["bn_beta"] - params["bn_mean"] * scale            # (1, D)
    return {
        "w1_bf16": (params["w1"] * scale).astype(jnp.bfloat16),      # (H, D)
        "b1_eff": (params["b1"] * scale + shift).astype(jnp.float32),
        "w2_row": params["w2"].reshape(1, -1).astype(jnp.float32),   # (1, D)
    }


def discriminator_forward(x, prepared, *, training: bool = False,
                          tile_n: int | None = None):
    """Discriminator forward in a single Pallas kernel.

    x: (N, H) float32, prepared: output of prepare_params().  Returns (N, 1)
    float32.  Eval mode (training=False) matches the PyTorch module's eval
    forward (running-stat BN + sigmoid).
    """
    w1 = prepared["w1_bf16"]      # (H, D) bf16
    b1 = prepared["b1_eff"]       # (1, D) f32
    w2 = prepared["w2_row"]       # (1, D) f32

    N, H = x.shape
    Hw, D = w1.shape
    assert H == Hw, (H, Hw)
    x = x.astype(jnp.float32)

    # Batch tile: large enough that each grid step streams >= ~512 KiB of x
    # (per-step overhead ~0.35 us dominates otherwise for small H), capped so
    # the "parallel" batch axis keeps >= 2 steps (v7x megacore) and never
    # exceeds the (8-rounded) batch.
    if tile_n is None:
        tile_n = max(512, min(4096, (1 << 19) // max(4 * H, 1)))
    tile_n = max(8, _round_up(tile_n, 8))
    n8 = _round_up(N, 8)
    if n8 > 8:
        tile_n = min(tile_n, max(8, _round_up((N + 1) // 2, 8)))
    tile_n = min(tile_n, n8)

    grid = (pl.cdiv(N, tile_n),)

    # Explicit VMEM budget: double-buffered x tile + output, resident weights
    # (conservatively counted double-buffered), plus headroom.  Safe on
    # v5e (16 MiB default scoped), v6e and v7x (64 MiB physical).
    vmem_needed = (2 * (tile_n * H * 4 + tile_n * 4)
                   + 2 * (H * D * 2 + 2 * D * 4))
    vmem_limit = int(min(max(3 * vmem_needed // 2 + (2 << 20), 16 << 20),
                         60 << 20))

    kernel = functools.partial(_discriminator_kernel,
                               apply_sigmoid=not training)

    cost = pl.CostEstimate(
        flops=2 * N * H * D + 3 * N * D,
        transcendentals=N,
        bytes_accessed=N * H * 4 + H * D * 2 + 2 * D * 4 + N * 4,
    )

    return pl.pallas_call(
        kernel,
        out_shape=jax.ShapeDtypeStruct((N, 1), jnp.float32),
        grid=grid,
        in_specs=[
            pl.BlockSpec((tile_n, H), lambda i: (i, 0)),   # x tile (f32 stream)
            pl.BlockSpec((H, D), lambda i: (0, 0)),        # w1 (bf16, resident)
            pl.BlockSpec((1, D), lambda i: (0, 0)),        # b1 (BN folded)
            pl.BlockSpec((1, D), lambda i: (0, 0)),        # w2 row
        ],
        out_specs=pl.BlockSpec((tile_n, 1), lambda i: (i, 0)),
        compiler_params=pltpu.CompilerParams(
            dimension_semantics=("parallel",),
            vmem_limit_bytes=vmem_limit),
        cost_estimate=cost,
    )(x, w1, b1, w2)


def init_params(key, h, out_dims):
    """Deterministic parameter init matching the module's shapes.

    Linear weights: xavier_normal (init_weight); Linear bias: PyTorch default
    uniform(-1/sqrt(fan_in), 1/sqrt(fan_in)); BatchNorm: PyTorch defaults.
    """
    k1, k2, k3 = jax.random.split(key, 3)
    std1 = (2.0 / (h + out_dims)) ** 0.5
    w1 = std1 * jax.random.normal(k1, (h, out_dims), jnp.float32)
    bound = 1.0 / (h ** 0.5)
    b1 = jax.random.uniform(k2, (1, out_dims), jnp.float32, -bound, bound)
    std2 = (2.0 / (out_dims + 1)) ** 0.5
    w2 = std2 * jax.random.normal(k3, (out_dims, 1), jnp.float32)
    return {
        "w1": w1,
        "b1": b1,
        "bn_gamma": jnp.ones((1, out_dims), jnp.float32),
        "bn_beta": jnp.zeros((1, out_dims), jnp.float32),
        "bn_mean": jnp.zeros((1, out_dims), jnp.float32),
        "bn_var": jnp.ones((1, out_dims), jnp.float32),
        "w2": w2,
    }


def _reference_forward(x, params, training=False):
    eps = 1e-5
    y = x @ params["w1"] + params["b1"]
    scale = params["bn_gamma"] / jnp.sqrt(params["bn_var"] + eps)
    shift = params["bn_beta"] - params["bn_mean"] * scale
    y = jnp.maximum(y * scale + shift, 0.0)
    z = y @ params["w2"]
    if not training:
        z = jax.nn.sigmoid(z)
    return z


if __name__ == "__main__":
    key = jax.random.PRNGKey(0)

    # Test 1: small shapes consistent with the module (Linear expects (N, H));
    # H not a multiple of 128 exercises full-extent (unpadded) feature blocks,
    # and the auto tile_n (32) gives a 2-step batch grid.
    N1, H1, D1 = 64, 32, 32
    k1, k2, k3, k4 = jax.random.split(key, 4)
    x1 = jax.random.normal(k1, (N1, H1), jnp.float32)
    params1 = init_params(k2, H1, D1)
    prep1 = prepare_params(params1)                      # one-time weight prep
    out1 = jax.block_until_ready(
        discriminator_forward(x1, prep1, training=False))
    ref1 = _reference_forward(x1, params1, training=False)
    assert out1.shape == (N1, 1)
    err1 = jnp.max(jnp.abs(out1 - ref1))
    assert jnp.allclose(out1, ref1, atol=2e-2, rtol=2e-2), f"max abs err {err1}"

    # Test 2: 128-aligned H (zero-copy x path) and a partial trailing batch
    # tile (N=50 with tile_n=32 -> masked last block).
    N2, H2, D2 = 50, 128, 96
    x2 = jax.random.normal(k3, (N2, H2), jnp.float32)
    params2 = init_params(k4, H2, D2)
    prep2 = prepare_params(params2)
    out2 = jax.block_until_ready(
        discriminator_forward(x2, prep2, training=False))
    ref2 = _reference_forward(x2, params2, training=False)
    assert out2.shape == (N2, 1)
    err2 = jnp.max(jnp.abs(out2 - ref2))
    assert jnp.allclose(out2, ref2, atol=2e-2, rtol=2e-2), f"max abs err {err2}"

    print("KERNEL_OK")
</pallas_src>

<mosaic_0001>
module attributes {stable_mosaic.version = 11 : i64} {
  func.func @_discriminator_kernel(%arg0: i32, %arg1: memref<32x32xf32, #tpu.memory_space<vmem>>, %arg2: memref<32x32xbf16, #tpu.memory_space<vmem>>, %arg3: memref<1x32xf32, #tpu.memory_space<vmem>>, %arg4: memref<1x32xf32, #tpu.memory_space<vmem>>, %arg5: memref<32x1xf32, #tpu.memory_space<vmem>>) attributes {dimension_semantics = [#tpu.dimension_semantics<parallel>], iteration_bounds = array<i64: 2>, scalar_prefetch = 0 : i64, scratch_operands = 0 : i64, tpu.core_type = #tpu.core_type<tc>, window_params = [{transform_indices = @transform_0, window_bounds = array<i64: 32, 32>}, {pipeline_mode = #tpu.pipeline_mode<synchronous>, transform_indices = @transform_1, window_bounds = array<i64: 32, 32>}, {pipeline_mode = #tpu.pipeline_mode<synchronous>, transform_indices = @transform_2, window_bounds = array<i64: 1, 32>}, {pipeline_mode = #tpu.pipeline_mode<synchronous>, transform_indices = @transform_3, window_bounds = array<i64: 1, 32>}, {transform_indices = @transform_4, window_bounds = array<i64: 32, 1>}]} {
    %c0 = arith.constant 0 : index
    %c0_0 = arith.constant 0 : index
    %0 = vector.load %arg1[%c0, %c0_0] : memref<32x32xf32, #tpu.memory_space<vmem>>, vector<32x32xf32>
    %1 = arith.truncf %0 : vector<32x32xf32> to vector<32x32xbf16>
    %c0_1 = arith.constant 0 : index
    %c0_2 = arith.constant 0 : index
    %2 = vector.load %arg2[%c0_1, %c0_2] : memref<32x32xbf16, #tpu.memory_space<vmem>>, vector<32x32xbf16>
    %cst = arith.constant dense<0.000000e+00> : vector<32x32xf32>
    %3 = tpu.matmul %1, %2, %cst {dimension_numbers = #tpu.dot_dimension_numbers<[1], [0], [0], [1], [0, 0, 1, 1], [], []>} : vector<32x32xbf16>, vector<32x32xbf16>, vector<32x32xf32> -> vector<32x32xf32>
    %c0_3 = arith.constant 0 : index
    %c0_4 = arith.constant 0 : index
    %4 = vector.load %arg3[%c0_3, %c0_4] : memref<1x32xf32, #tpu.memory_space<vmem>>, vector<1x32xf32>
    %5 = vector.broadcast %4 : vector<1x32xf32> to vector<32x32xf32>
    %6 = arith.addf %3, %5 : vector<32x32xf32>
    %cst_5 = arith.constant 0.000000e+00 : f32
    %7 = vector.broadcast %cst_5 : f32 to vector<32x32xf32>
    %8 = arith.maximumf %6, %7 : vector<32x32xf32>
    %c0_6 = arith.constant 0 : index
    %c0_7 = arith.constant 0 : index
    %9 = vector.load %arg4[%c0_6, %c0_7] : memref<1x32xf32, #tpu.memory_space<vmem>>, vector<1x32xf32>
    %10 = vector.broadcast %9 : vector<1x32xf32> to vector<32x32xf32>
    %11 = arith.mulf %8, %10 : vector<32x32xf32>
    %cst_8 = arith.constant dense<0.000000e+00> : vector<32xf32>
    %12 = vector.multi_reduction <add>, %11, %cst_8 [1] : vector<32x32xf32> to vector<32xf32>
    %13 = vector.shape_cast %12 : vector<32xf32> to vector<32x1xf32>
    %cst_9 = arith.constant 5.000000e-01 : f32
    %14 = vector.broadcast %cst_9 : f32 to vector<32x1xf32>
    %15 = arith.mulf %14, %13 : vector<32x1xf32>
    %16 = math.tanh %15 : vector<32x1xf32>
    %cst_10 = arith.constant 1.000000e+00 : f32
    %17 = vector.broadcast %cst_10 : f32 to vector<32x1xf32>
    %18 = arith.addf %16, %17 : vector<32x1xf32>
    %cst_11 = arith.constant 5.000000e-01 : f32
    %19 = vector.broadcast %cst_11 : f32 to vector<32x1xf32>
    %20 = arith.mulf %19, %18 : vector<32x1xf32>
    %c0_12 = arith.constant 0 : index
    %c0_13 = arith.constant 0 : index
    %21 = vector.load %arg5[%c0_12, %c0_13] : memref<32x1xf32, #tpu.memory_space<vmem>>, vector<32x1xf32>
    tpu.vector_store %arg5[%c0_12, %c0_13], %20 {strides = array<i32>} : memref<32x1xf32, #tpu.memory_space<vmem>>, vector<32x1xf32>,
    return
  }
  func.func @transform_0(%arg0: i32) -> (i32, i32) {
    %c0_i32 = arith.constant 0 : i32
    %c0_i32_0 = arith.constant 0 : i32
    return %arg0, %c0_i32 : i32, i32
  }
  func.func @transform_1(%arg0: i32) -> (i32, i32) {
    %c0_i32 = arith.constant 0 : i32
    %c0_i32_0 = arith.constant 0 : i32
    %c0_i32_1 = arith.constant 0 : i32
    return %c0_i32, %c0_i32_0 : i32, i32
  }
  func.func @transform_2(%arg0: i32) -> (i32, i32) {
    %c0_i32 = arith.constant 0 : i32
    %c0_i32_0 = arith.constant 0 : i32
    %c0_i32_1 = arith.constant 0 : i32
    return %c0_i32, %c0_i32_0 : i32, i32
  }
  func.func @transform_3(%arg0: i32) -> (i32, i32) {
    %c0_i32 = arith.constant 0 : i32
    %c0_i32_0 = arith.constant 0 : i32
    %c0_i32_1 = arith.constant 0 : i32
    return %c0_i32, %c0_i32_0 : i32, i32
  }
  func.func @transform_4(%arg0: i32) -> (i32, i32) {
    %c0_i32 = arith.constant 0 : i32
    %c0_i32_0 = arith.constant 0 : i32
    return %arg0, %c0_i32 : i32, i32
  }
}

</mosaic_0001>

<bundles_post_ra>
// kernel: tpu_custom_call.1
= control target key start
LH: loop header
LB: loop body
LE: loop exit
PB: predicated region body
PF: predicated region fallthrough
CT: control target
= control target key end

     0   :  { %s471_s15 = smov 0   ;;  %s513_s0 = inlined_call_operand.vmem [shape: f32[64,32], index: 0, kind: input, shape index: {}]   ;;  %s514_s1 = inlined_call_operand.vmem [shape: bf16[32,32], index: 1, kind: input, shape index: {}]   ;;  %s515_s2 = inlined_call_operand.vmem [shape: f32[1,32], index: 2, kind: input, shape index: {}]   ;;  %s516_s3 = inlined_call_operand.vmem [shape: f32[1,32], index: 3, kind: input, shape index: {}]   ;;  %s517_s4 = inlined_call_operand.vmem [shape: f32[64,1], index: 4, kind: output, shape index: {}]  }
   0x1 LB: > { %s391_s16 = sadd.s32 4294967295, %s444_s15   ;;  %p395_p0 = scmp.ge.s32.totalorder %s444_s15, 1  ;;  %s444_s15 = sphi %s471_s15, %s14_s15  }
   0x2   : > { %p163_p1 = scmp.lt.s32.totalorder %s444_s15, 3 }
   0x4   : > { %p164_p2 = pnand %p395_p0, %p163_p1 }
   0x5   : > { %s396_s19 = sshll.u32 (!%p164_p2), %s391_s16, 2 }
   0x6   : > { %167 = sbr.rel (%p164_p2) target bundleno = 385 (0x181), region = 36  ;;  %p190_p3 = scmp.lt.s32.totalorder (!%p164_p2), %s396_s19, 7 }
   0xb   : > { %v428_v0 = vld [vmem:[%s514_s1 + $0x8] sm:$0xff]   ;;  %v429_v1 = vld [vmem:[%s514_s1] sm:$0xff]   ;;  %s519_s19 = smov (!%p190_p3, %s396_s19), 7  ;;  %vm231_vm0 = vcmask 261120   ;;  %vm330_vm1 = vcmask 7168  }
   0xc   : > { %412 = vmatprep.subr.bf16.mxu0 %v428_v0  ;;  %s397_s22 = sshll.u32 %s519_s19, 3  ;;  %v400_v8 = vld [vmem:[%s515_s2] ss:$0 sm:$0xff] }
   0xd   : > { %413 = vmatpush3.bf16.msra.mxu0 %v428_v0  ;;  %s193_s25 = scalar_lea.vmem %s513_s0, %s397_s22  ;;  %v405_v12 = vld [vmem:[%s516_s3] ss:$0 sm:$0xff]  ;;  %s199_s6 = scalar_lea.vmem %s517_s4, %s397_s22 }
   0xe   : > { %414 = vmatprep.subr.bf16.mxu0 %v429_v1  ;;  %v202_v2 = vld [vmem:[%s193_s25] sm:$0xff]  ;;  %v203_v3 = vld [vmem:[%s193_s25 + $0x8] sm:$0xff]  ;;  %v204_v4 = vld [vmem:[%s193_s25 + $0x10] sm:$0xff] }
   0xf   : > { %v206_v5 = vpack.c.bf16 %v203_v3, %v202_v2  ;;  %v205_v6 = vld [vmem:[%s193_s25 + $0x18] sm:$0xff] }
  0x10   : > { %v207_v7 = vpack.c.bf16 %v205_v6, %v204_v4 }
  0x11   : > { %415 = vmatpush3.bf16.msra.mxu0 %v429_v1  ;;  %416 = vmatprep.mubr.msk.bf16.mxu0 %vm231_vm0, %v206_v5 }
  0x14   : > { %417 = vmatmul.mubr.msk.bf16.vlgmr.msra.gmra.mxu0 %vm231_vm0, %v207_v7 }
  0xd4   : > { %v418_v9 = vpop.f32.mrf.mxu0 }
  0xd5   : > { %v281_v10 = vadd.f32 %v418_v9, %v400_v8 }
  0xd6   : > { %v272_v11 = vpop.f32.mrf.mxu0 }
  0xd7   : > { %v289_v13 = vmax.f32 %v281_v10, 0.0  ;;  %v273_v14 = vadd.f32 %v400_v8, %v272_v11 }
  0xd8   : > { %v419_v15 = vpop.f32.mrf.mxu0 }
  0xd9   : > { %v287_v16 = vmax.f32 %v273_v14, 0.0  ;;  %v284_v17 = vadd.f32 %v419_v15, %v400_v8  ;;  %v300_v18 = vmul.f32 %v405_v12, %v289_v13 }
  0xda   : > { %v275_v19 = vpop.f32.mrf.mxu0 }
  0xdb   : > { %v290_v20 = vmax.f32 %v284_v17, 0.0  ;;  %v276_v21 = vadd.f32 %v400_v8, %v275_v19  ;;  %v308_v22 = vsel %vm231_vm0, %v300_v18, 0.0  ;;  %v298_v23 = vmul.f32 %v405_v12, %v287_v16 }
  0xdc   : > { %309 = vadd.xlane.f32.xlu1 %v308_v22 }
  0xdd   : > { %v288_v24 = vmax.f32 %v276_v21, 0.0  ;;  %v302_v25 = vsel %vm231_vm0, %v298_v23, 0.0  ;;  %v301_v26 = vmul.f32 %v405_v12, %v290_v20 }
  0xde   : > { %303 = vadd.xlane.f32.xlu0 %v302_v25 }
  0xdf   : > { %v311_v27 = vsel %vm231_vm0, %v301_v26, 0.0  ;;  %v299_v28 = vmul.f32 %v405_v12, %v288_v24 }
  0xe0   : > { %312 = vadd.xlane.f32.xlu1 %v311_v27 }
  0xe1   : > { %v305_v29 = vsel %vm231_vm0, %v299_v28, 0.0 }
  0xe2   : > { %306 = vadd.xlane.f32.xlu0 %v305_v29 }
 0x165   : > { %v310_v30 = vpop.xlane.xlu1 %309 }
 0x166   : > { %v316_v31 = vmul.f32 0.5, %v310_v30 }
 0x167   : > { %v304_v32 = vpop.xlane.xlu0 %303 }
 0x168   : > { %v314_v33 = vmul.f32 0.5, %v304_v32 }
 0x169   : > { %v313_v34 = vpop.xlane.xlu1 %312 }
 0x16a   : > { %430 = vtanh.f32 %v314_v33  ;;  %v317_v35 = vmul.f32 0.5, %v313_v34 }
 0x16b   : > { %432 = vtanh.f32 %v316_v31  ;;  %v307_v36 = vpop.xlane.xlu0 %306 }
 0x16c   : > { %434 = vtanh.f32 %v317_v35  ;;  %v315_v37 = vmul.f32 0.5, %v307_v36 }
 0x16e   : > { %436 = vtanh.f32 %v315_v37 }
 0x177   : > { %v431_v38 = vpop.eup %430 }
 0x178   : > { %v433_v39 = vpop.eup %432  ;;  %v322_v40 = vadd.f32 1.0, %v431_v38 }
 0x179   : > { %v435_v41 = vpop.eup %434  ;;  %v324_v44 = vadd.f32 1.0, %v433_v39 }
 0x17a   : > { %v326_v42 = vmul.f32 0.5, %v322_v40  ;;  %v325_v45 = vadd.f32 1.0, %v435_v41 }
 0x17b   : > { %v437_v43 = vpop.eup %436  ;;  %v328_v48 = vmul.f32 0.5, %v324_v44 }
 0x17c   : > { %331 = vst.msk [vmem:[%s199_s6] sm:$0xff] %vm330_vm1, %v326_v42  ;;  %v323_v46 = vadd.f32 1.0, %v437_v43  ;;  %v329_v49 = vmul.f32 0.5, %v325_v45 }
 0x17d   : > { %333 = vst.msk [vmem:[%s199_s6 + $0x10] sm:$0xff] %vm330_vm1, %v328_v48 }
 0x17e   : > { %v327_v47 = vmul.f32 0.5, %v323_v46  ;;  %334 = vst.msk [vmem:[%s199_s6 + $0x18] sm:$0xff] %vm330_vm1, %v329_v49 }
 0x180   : > { %332 = vst.msk [vmem:[%s199_s6 + $0x8] sm:$0xff] %vm330_vm1, %v327_v47 }
 0x181 PF: > { %s14_s15 = sadd.s32 1, %s444_s15  }
 0x182   : > { %p11_p4 = scmp.ge.s32.totalorder %s14_s15, 4  }
 0x184   :  { %13 = sbr.rel (!%p11_p4) target bundleno = 1 (0x1), region = 66 }

</bundles_post_ra>
